<compile_context>
chip_gen: v6e
topology: v6e:2x2x1
jax: 0.10.0
libtpu: 0.0.40
codegen_flags: <defaults>
</compile_context>

<pallas_src>
import math

import jax
import jax.numpy as jnp
from jax.experimental import pallas as pl
from jax.experimental.pallas import tpu as pltpu


def _round_up(x, m):
    return ((x + m - 1) // m) * m


def classifier_kernel(x_ref, w1_ref, b1_ref, w2_ref, b2_ref, wm_ref, out_ref):
    # x:   (TB, Fp)  bf16   flattened input tile
    # w1:  (Fp, Hp)  bf16   first Linear weight with BN scale folded in
    # b1:  (1,  Hp)  f32    folded bias (b1*scale + shift)
    # w2:  (Hp, Fp)  bf16   second Linear weight
    # b2:  (1,  Fp)  f32
    # wm:  (Fp, Cp)  bf16   AdaCos weight, pre-normalized per class column
    # out: (TB, Cp)  f32    cosine logits
    x = x_ref[...]

    # Linear 1 (BN folded) + ReLU -- f32 accumulation on the MXU.
    h = jnp.dot(x, w1_ref[...], preferred_element_type=jnp.float32)
    h = jnp.maximum(h + b1_ref[...], 0.0)

    # Linear 2
    y = jnp.dot(h.astype(jnp.bfloat16), w2_ref[...],
                preferred_element_type=jnp.float32) + b2_ref[...]

    # Row L2-normalize via rsqrt (EUP slot, ~free next to the MXU work).
    # Matches F.normalize(dim=1, eps=1e-12) semantics for non-degenerate rows.
    sumsq = jnp.sum(y * y, axis=-1, keepdims=True)
    inv = jax.lax.rsqrt(jnp.maximum(sumsq, 1e-24))
    y_norm = (y * inv).astype(jnp.bfloat16)

    # Cosine logits (wm already column-normalized in the wrapper).
    out_ref[...] = jnp.dot(y_norm, wm_ref[...],
                           preferred_element_type=jnp.float32)


def classifier_forward(x, params, *, batch_tile=256):
    """x: any shape (B, ...); flattened to (B, in_features) like x.view(B, -1)."""
    B = x.shape[0]
    x2d = x.reshape(B, -1).astype(jnp.float32)

    w1, b1, gamma, beta, run_mean, run_var, w2, b2, wm = (
        params["w1"], params["b1"], params["gamma"], params["beta"],
        params["run_mean"], params["run_var"], params["w2"], params["b2"],
        params["wm"])

    F = w1.shape[1]      # in_features
    H = w1.shape[0]      # hide_classes
    C = wm.shape[0]      # n_classes

    # ---- fold BatchNorm1d (eval mode) + b1 into the first Linear -------------
    eps = 1e-5
    bn_scale = gamma / jnp.sqrt(run_var + eps)          # (H,)
    bn_shift = beta - run_mean * bn_scale               # (H,)
    w1_folded = (w1 * bn_scale[:, None]).T              # (F, H)
    b1_folded = b1 * bn_scale + bn_shift                # (H,)

    # ---- pre-normalize AdaCos class weights (hoisted out of the kernel) -----
    wm_norm = wm / jnp.maximum(
        jnp.sqrt(jnp.sum(wm * wm, axis=1, keepdims=True)), 1e-12)   # (C, F)
    wm_t = wm_norm.T                                                 # (F, C)

    # ---- pad to lane-dense shapes --------------------------------------------
    Fp = _round_up(F, 128)
    Hp = _round_up(H, 128)
    Cp = _round_up(C, 128)

    w1p = jnp.pad(w1_folded, ((0, Fp - F), (0, Hp - H)))
    b1p = jnp.pad(b1_folded, (0, Hp - H)).reshape(1, Hp)
    w2p = jnp.pad(w2.T, ((0, Hp - H), (0, Fp - F)))      # (Hp, Fp)
    b2p = jnp.pad(b2, (0, Fp - F)).reshape(1, Fp)
    wmp = jnp.pad(wm_t, ((0, Fp - F), (0, Cp - C)))      # (Fp, Cp)

    # ---- batch tile sized against a v7x-safe VMEM budget ---------------------
    weight_bytes = (w1p.size + w2p.size + wmp.size) * 2 + (b1p.size + b2p.size) * 4
    # per batch-row: double-buffered bf16 x tile + double-buffered f32 out tile
    # + rough f32 intermediates (h, y) inside the kernel.
    per_row = 2 * (Fp * 2) + 2 * (Cp * 4) + (Hp + Fp) * 4
    budget = 48 * 1024 * 1024

    Bp8 = _round_up(B, 8)
    TB = min(batch_tile, Bp8)
    TB = _round_up(TB, 8)
    while TB > 8 and weight_bytes + TB * per_row > budget:
        TB = _round_up(max(8, TB // 2), 8)
    Bp = _round_up(B, TB)

    xp = jnp.pad(x2d, ((0, Bp - B), (0, Fp - F)))

    # bf16 matmul operands, f32 accumulation / biases / elementwise.
    xp = xp.astype(jnp.bfloat16)
    w1p = w1p.astype(jnp.bfloat16)
    w2p = w2p.astype(jnp.bfloat16)
    wmp = wmp.astype(jnp.bfloat16)

    grid = (Bp // TB,)

    needed = weight_bytes + TB * per_row
    vmem_limit = int(min(2 * needed + 16 * 1024 * 1024, 56 * 1024 * 1024))

    cost = pl.CostEstimate(
        flops=2 * Bp * Fp * Hp + 2 * Bp * Hp * Fp + 2 * Bp * Fp * Cp,
        transcendentals=Bp,
        bytes_accessed=int(xp.size * 2 + weight_bytes + Bp * Cp * 4),
    )

    out = pl.pallas_call(
        classifier_kernel,
        out_shape=jax.ShapeDtypeStruct((Bp, Cp), jnp.float32),
        grid=grid,
        in_specs=[
            pl.BlockSpec((TB, Fp), lambda i: (i, 0)),   # x tile (streamed)
            pl.BlockSpec((Fp, Hp), lambda i: (0, 0)),   # w1 (VMEM-resident)
            pl.BlockSpec((1, Hp), lambda i: (0, 0)),    # b1 (resident)
            pl.BlockSpec((Hp, Fp), lambda i: (0, 0)),   # w2 (resident)
            pl.BlockSpec((1, Fp), lambda i: (0, 0)),    # b2 (resident)
            pl.BlockSpec((Fp, Cp), lambda i: (0, 0)),   # wm (resident)
        ],
        out_specs=pl.BlockSpec((TB, Cp), lambda i: (i, 0)),
        compiler_params=pltpu.CompilerParams(
            dimension_semantics=("parallel",),
            vmem_limit_bytes=vmem_limit,
        ),
        cost_estimate=cost,
    )(xp, w1p, b1p, w2p, b2p, wmp)

    return out[:B, :C]


def init_params(key, in_features, hide_classes, n_classes):
    ks = jax.random.split(key, 8)
    # nn.Linear default init: U(-1/sqrt(fan_in), 1/sqrt(fan_in))
    lim1 = 1.0 / math.sqrt(in_features)
    lim2 = 1.0 / math.sqrt(hide_classes)
    # AdaCos W: xavier_uniform over (n_classes, in_features)
    lim3 = math.sqrt(6.0 / (n_classes + in_features))
    return {
        "w1": jax.random.uniform(ks[0], (hide_classes, in_features),
                                 jnp.float32, -lim1, lim1),
        "b1": jax.random.uniform(ks[1], (hide_classes,), jnp.float32, -lim1, lim1),
        "gamma": 1.0 + 0.1 * jax.random.normal(ks[2], (hide_classes,), jnp.float32),
        "beta": 0.1 * jax.random.normal(ks[3], (hide_classes,), jnp.float32),
        "run_mean": 0.05 * jax.random.normal(ks[4], (hide_classes,), jnp.float32),
        "run_var": jnp.abs(1.0 + 0.1 * jax.random.normal(ks[5], (hide_classes,),
                                                         jnp.float32)),
        "w2": jax.random.uniform(ks[6], (in_features, hide_classes),
                                 jnp.float32, -lim2, lim2),
        "b2": jax.random.uniform(ks[7], (in_features,), jnp.float32, -lim2, lim2),
        "wm": jax.random.uniform(jax.random.fold_in(key, 99),
                                 (n_classes, in_features), jnp.float32,
                                 -lim3, lim3),
    }


def reference_forward(x, params):
    """Pure-JAX f32 reference matching the eval-mode PyTorch module (t=None)."""
    B = x.shape[0]
    x2d = x.reshape(B, -1).astype(jnp.float32)
    eps = 1e-5
    h = x2d @ params["w1"].T + params["b1"]
    h = ((h - params["run_mean"]) / jnp.sqrt(params["run_var"] + eps)
         * params["gamma"] + params["beta"])
    h = jnp.maximum(h, 0.0)
    y = h @ params["w2"].T + params["b2"]
    yn = y / jnp.maximum(jnp.sqrt(jnp.sum(y * y, axis=1, keepdims=True)), 1e-12)
    wm = params["wm"]
    wn = wm / jnp.maximum(jnp.sqrt(jnp.sum(wm * wm, axis=1, keepdims=True)), 1e-12)
    return yn @ wn.T


if __name__ == "__main__":
    key = jax.random.PRNGKey(0)
    k_x, k_p = jax.random.split(key)

    # small shapes: batch=8, in_channels=1, spatial 8x8 -> in_features=64
    B, Hsp, Wsp = 8, 8, 8
    in_features = Hsp * Wsp          # 64
    hide_classes = 32
    n_classes = 16

    x = jax.random.normal(k_x, (B, 1, Hsp, Wsp), jnp.float32)   # NCHW input
    params = init_params(k_p, in_features, hide_classes, n_classes)

    logits = classifier_forward(x, params)
    jax.block_until_ready(logits)

    assert logits.shape == (B, n_classes)
    assert bool(jnp.all(jnp.isfinite(logits)))
    # cosine logits (bf16 matmul operands -> small rounding slack)
    assert float(jnp.max(jnp.abs(logits))) <= 1.0 + 1e-2

    ref = reference_forward(x, params)
    max_err = float(jnp.max(jnp.abs(logits - ref)))
    assert max_err < 3e-2, f"max abs error vs reference: {max_err}"

    print("KERNEL_OK")
</pallas_src>

<mosaic_0001>
module attributes {stable_mosaic.version = 11 : i64} {
  func.func @classifier_kernel(%arg0: i32, %arg1: memref<8x128xbf16, #tpu.memory_space<vmem>>, %arg2: memref<128x128xbf16, #tpu.memory_space<vmem>>, %arg3: memref<1x128xf32, #tpu.memory_space<vmem>>, %arg4: memref<128x128xbf16, #tpu.memory_space<vmem>>, %arg5: memref<1x128xf32, #tpu.memory_space<vmem>>, %arg6: memref<128x128xbf16, #tpu.memory_space<vmem>>, %arg7: memref<8x128xf32, #tpu.memory_space<vmem>>) attributes {dimension_semantics = [#tpu.dimension_semantics<parallel>], iteration_bounds = array<i64: 1>, scalar_prefetch = 0 : i64, scratch_operands = 0 : i64, tpu.core_type = #tpu.core_type<tc>, window_params = [{transform_indices = @transform_0, window_bounds = array<i64: 8, 128>}, {pipeline_mode = #tpu.pipeline_mode<synchronous>, transform_indices = @transform_1, window_bounds = array<i64: 128, 128>}, {pipeline_mode = #tpu.pipeline_mode<synchronous>, transform_indices = @transform_2, window_bounds = array<i64: 1, 128>}, {pipeline_mode = #tpu.pipeline_mode<synchronous>, transform_indices = @transform_3, window_bounds = array<i64: 128, 128>}, {pipeline_mode = #tpu.pipeline_mode<synchronous>, transform_indices = @transform_4, window_bounds = array<i64: 1, 128>}, {pipeline_mode = #tpu.pipeline_mode<synchronous>, transform_indices = @transform_5, window_bounds = array<i64: 128, 128>}, {transform_indices = @transform_6, window_bounds = array<i64: 8, 128>}]} {
    %c0 = arith.constant 0 : index
    %c0_0 = arith.constant 0 : index
    %0 = vector.load %arg1[%c0, %c0_0] : memref<8x128xbf16, #tpu.memory_space<vmem>>, vector<8x128xbf16>
    %c0_1 = arith.constant 0 : index
    %c0_2 = arith.constant 0 : index
    %1 = vector.load %arg2[%c0_1, %c0_2] : memref<128x128xbf16, #tpu.memory_space<vmem>>, vector<128x128xbf16>
    %cst = arith.constant dense<0.000000e+00> : vector<8x128xf32>
    %2 = tpu.matmul %0, %1, %cst {dimension_numbers = #tpu.dot_dimension_numbers<[1], [0], [0], [1], [0, 0, 1, 1], [], []>} : vector<8x128xbf16>, vector<128x128xbf16>, vector<8x128xf32> -> vector<8x128xf32>
    %c0_3 = arith.constant 0 : index
    %c0_4 = arith.constant 0 : index
    %3 = vector.load %arg3[%c0_3, %c0_4] : memref<1x128xf32, #tpu.memory_space<vmem>>, vector<1x128xf32>
    %4 = vector.broadcast %3 : vector<1x128xf32> to vector<8x128xf32>
    %5 = arith.addf %2, %4 : vector<8x128xf32>
    %cst_5 = arith.constant 0.000000e+00 : f32
    %6 = vector.broadcast %cst_5 : f32 to vector<8x128xf32>
    %7 = arith.maximumf %5, %6 : vector<8x128xf32>
    %8 = arith.truncf %7 : vector<8x128xf32> to vector<8x128xbf16>
    %c0_6 = arith.constant 0 : index
    %c0_7 = arith.constant 0 : index
    %9 = vector.load %arg4[%c0_6, %c0_7] : memref<128x128xbf16, #tpu.memory_space<vmem>>, vector<128x128xbf16>
    %cst_8 = arith.constant dense<0.000000e+00> : vector<8x128xf32>
    %10 = tpu.matmul %8, %9, %cst_8 {dimension_numbers = #tpu.dot_dimension_numbers<[1], [0], [0], [1], [0, 0, 1, 1], [], []>} : vector<8x128xbf16>, vector<128x128xbf16>, vector<8x128xf32> -> vector<8x128xf32>
    %c0_9 = arith.constant 0 : index
    %c0_10 = arith.constant 0 : index
    %11 = vector.load %arg5[%c0_9, %c0_10] : memref<1x128xf32, #tpu.memory_space<vmem>>, vector<1x128xf32>
    %12 = vector.broadcast %11 : vector<1x128xf32> to vector<8x128xf32>
    %13 = arith.addf %10, %12 : vector<8x128xf32>
    %14 = arith.mulf %13, %13 : vector<8x128xf32>
    %cst_11 = arith.constant dense<0.000000e+00> : vector<8xf32>
    %15 = vector.multi_reduction <add>, %14, %cst_11 [1] : vector<8x128xf32> to vector<8xf32>
    %16 = vector.shape_cast %15 : vector<8xf32> to vector<8x1xf32>
    %cst_12 = arith.constant 1.000000e-24 : f32
    %17 = vector.broadcast %cst_12 : f32 to vector<8x1xf32>
    %18 = arith.maximumf %16, %17 : vector<8x1xf32>
    %19 = math.rsqrt %18 : vector<8x1xf32>
    %20 = vector.broadcast %19 : vector<8x1xf32> to vector<8x128xf32>
    %21 = arith.mulf %13, %20 : vector<8x128xf32>
    %22 = arith.truncf %21 : vector<8x128xf32> to vector<8x128xbf16>
    %c0_13 = arith.constant 0 : index
    %c0_14 = arith.constant 0 : index
    %23 = vector.load %arg6[%c0_13, %c0_14] : memref<128x128xbf16, #tpu.memory_space<vmem>>, vector<128x128xbf16>
    %cst_15 = arith.constant dense<0.000000e+00> : vector<8x128xf32>
    %24 = tpu.matmul %22, %23, %cst_15 {dimension_numbers = #tpu.dot_dimension_numbers<[1], [0], [0], [1], [0, 0, 1, 1], [], []>} : vector<8x128xbf16>, vector<128x128xbf16>, vector<8x128xf32> -> vector<8x128xf32>
    %c0_16 = arith.constant 0 : index
    %c0_17 = arith.constant 0 : index
    %25 = vector.load %arg7[%c0_16, %c0_17] : memref<8x128xf32, #tpu.memory_space<vmem>>, vector<8x128xf32>
    tpu.vector_store %arg7[%c0_16, %c0_17], %24 {strides = array<i32>} : memref<8x128xf32, #tpu.memory_space<vmem>>, vector<8x128xf32>,
    return
  }
  func.func @transform_0(%arg0: i32) -> (i32, i32) {
    %c0_i32 = arith.constant 0 : i32
    %c0_i32_0 = arith.constant 0 : i32
    return %arg0, %c0_i32 : i32, i32
  }
  func.func @transform_1(%arg0: i32) -> (i32, i32) {
    %c0_i32 = arith.constant 0 : i32
    %c0_i32_0 = arith.constant 0 : i32
    %c0_i32_1 = arith.constant 0 : i32
    return %c0_i32, %c0_i32_0 : i32, i32
  }
  func.func @transform_2(%arg0: i32) -> (i32, i32) {
    %c0_i32 = arith.constant 0 : i32
    %c0_i32_0 = arith.constant 0 : i32
    %c0_i32_1 = arith.constant 0 : i32
    return %c0_i32, %c0_i32_0 : i32, i32
  }
  func.func @transform_3(%arg0: i32) -> (i32, i32) {
    %c0_i32 = arith.constant 0 : i32
    %c0_i32_0 = arith.constant 0 : i32
    %c0_i32_1 = arith.constant 0 : i32
    return %c0_i32, %c0_i32_0 : i32, i32
  }
  func.func @transform_4(%arg0: i32) -> (i32, i32) {
    %c0_i32 = arith.constant 0 : i32
    %c0_i32_0 = arith.constant 0 : i32
    %c0_i32_1 = arith.constant 0 : i32
    return %c0_i32, %c0_i32_0 : i32, i32
  }
  func.func @transform_5(%arg0: i32) -> (i32, i32) {
    %c0_i32 = arith.constant 0 : i32
    %c0_i32_0 = arith.constant 0 : i32
    %c0_i32_1 = arith.constant 0 : i32
    return %c0_i32, %c0_i32_0 : i32, i32
  }
  func.func @transform_6(%arg0: i32) -> (i32, i32) {
    %c0_i32 = arith.constant 0 : i32
    %c0_i32_0 = arith.constant 0 : i32
    return %arg0, %c0_i32 : i32, i32
  }
}

</mosaic_0001>

<bundles_post_ra>
// kernel: tpu_custom_call.1
= control target key start
LH: loop header
LB: loop body
LE: loop exit
PB: predicated region body
PF: predicated region fallthrough
CT: control target
= control target key end

     0   :  { %11 = vsyncpa [#allocation3], 0  ;;  %s792_s0 = inlined_call_operand.hbm [shape: bf16[8,128], index: 0, kind: input, shape index: {}]   ;;  %s793_s1 = inlined_call_operand.hbm [shape: bf16[128,128], index: 1, kind: input, shape index: {}]   ;;  %s794_s2 = inlined_call_operand.vmem [shape: f32[1,128], index: 2, kind: input, shape index: {}]   ;;  %s795_s3 = inlined_call_operand.hbm [shape: bf16[128,128], index: 3, kind: input, shape index: {}]   ;;  %s796_s4 = inlined_call_operand.vmem [shape: f32[1,128], index: 4, kind: input, shape index: {}]   ;;  %s797_s5 = inlined_call_operand.hbm [shape: bf16[128,128], index: 5, kind: input, shape index: {}]   ;;  %s798_s6 = inlined_call_operand.hbm [shape: f32[8,128], index: 6, kind: output, shape index: {}]  }
   0x1   :  { %12 = vsyncpa [#allocation6], 0 }
   0x2   :  { %13 = vsyncpa [#allocation9], 0 }
   0x3   :  { %14 = vsyncpa [#allocation4], 0  ;;  %s688_s21 = smov [#allocation5]  }
   0x4   :  { %s30_s22 = sshll.u32 %s688_s21, 4  ;;  %s31_s22 = int_to_ptr.vmem [resolvable:$true] %s30_s22 }
   0x5   :  { %s588_s23 = scalar_lea.vmem %s31_s22, 1024  ;;  %p593_p1 = scmp.lt.s32.totalorder %s31_s22, %s31_s22 }
   0x6   :  { %p589_p0 = scmp.ne.s32.totalorder %s31_s22, %s588_s23  ;;  %p594_p2 = scmp.lt.s32.totalorder %s588_s23, %s588_s23 }
   0x8   :  { %p595_p3 = por %p594_p2, %p593_p1 }
   0xa   :  { %p596_p4 = pnand %p595_p3, %p589_p0 }
   0xc   :  { %599 = shalt.err (!%p596_p4)
}
   0xd   :  { %s689_s24 = smov 64   ;;  %s690_s25 = smov 4  }
   0xe   :  { %36 = dma.hbm_to_vmem [thread:$0]  %s793_s1, 1024, %s31_s22, [#allocation6], %s689_s24, %s689_s24, %s690_s25  }
   0xf   :  { %s691_s28 = smov [#allocation2]   ;;  %s692_s30 = smov [#allocation7]  }
  0x10   :  { %s21_s29 = sshll.u32 %s691_s28, 4  ;;  %s44_s7 = sshll.u32 %s692_s30, 4  ;;  %s22_s29 = int_to_ptr.vmem [resolvable:$true] %s21_s29  ;;  %s45_s7 = int_to_ptr.vmem [resolvable:$true] %s44_s7 }
  0x11   :  { %s608_s8 = scalar_lea.vmem %s22_s29, 64  ;;  %p613_p6 = scmp.lt.s32.totalorder %s22_s29, %s22_s29 }
  0x12   :  { %p609_p5 = scmp.ne.s32.totalorder %s22_s29, %s608_s8  ;;  %p614_p7 = scmp.lt.s32.totalorder %s608_s8, %s608_s8 }
  0x14   :  { %p615_p8 = por %p614_p7, %p613_p6 }
  0x16   :  { %p616_p9 = pnand %p615_p8, %p609_p5 }
  0x18   :  { %619 = shalt.err (!%p616_p9)
}
  0x19   :  { %24 = dma.hbm_to_vmem [thread:$0]  %s792_s0, 64, %s22_s29, [#allocation3]  }
  0x1a   :  { %s628_s11 = scalar_lea.vmem %s45_s7, 1024  ;;  %p633_p11 = scmp.lt.s32.totalorder %s45_s7, %s45_s7 }
  0x1b   :  { %p629_p10 = scmp.ne.s32.totalorder %s45_s7, %s628_s11  ;;  %p634_p12 = scmp.lt.s32.totalorder %s628_s11, %s628_s11 }
  0x1d   :  { %p635_p13 = por %p634_p12, %p633_p11 }
  0x1f   :  { %p636_p0 = pnand %p635_p13, %p629_p10 }
  0x21   :  { %639 = shalt.err (!%p636_p0)
}
  0x22   :  { %50 = dma.hbm_to_vmem [thread:$0]  %s795_s3, 1024, %s45_s7, [#allocation6], %s689_s24, %s689_s24, %s690_s25  }
  0x23   :  { %s693_s13 = smov [#allocation8]  }
  0x24   :  { %s58_s14 = sshll.u32 %s693_s13, 4  ;;  %s59_s14 = int_to_ptr.vmem [resolvable:$true] %s58_s14 }
  0x25   :  { %s648_s15 = scalar_lea.vmem %s59_s14, 1024  ;;  %p653_p2 = scmp.lt.s32.totalorder %s59_s14, %s59_s14 }
  0x26   :  { %p649_p1 = scmp.ne.s32.totalorder %s59_s14, %s648_s15  ;;  %p654_p3 = scmp.lt.s32.totalorder %s648_s15, %s648_s15 }
  0x28   :  { %p655_p4 = por %p654_p3, %p653_p2 }
  0x2a   :  { %p656_p5 = pnand %p655_p4, %p649_p1 }
  0x2c   :  { %659 = shalt.err (!%p656_p5)
}
  0x2d   :  { %64 = dma.hbm_to_vmem [thread:$0]  %s797_s5, 1024, %s59_s14, [#allocation9], %s689_s24, %s689_s24, %s690_s25  }
  0x2e   :  { %680 = dma.done.wait [#allocation3], 64  }
  0x2f   :  { %681 = vsyncadd [#allocation3], 4294967232 }
  0x30   :  { %682 = dma.done.wait [#allocation6], 2048  }
  0x31   :  { %683 = vsyncadd [#allocation6], 4294965248 }
  0x32   :  { %684 = dma.done.wait [#allocation9], 1024  }
  0x33   :  { %685 = vsyncadd [#allocation9], 4294966272  ;;  %v694_v0 = vmov 0.0   ;;  %vm695_vm0 = vmmov 0   ;;  %v554_v1 = vld [vmem:[#allocation5 + $0x38] sm:$0xff]   ;;  %v555_v2 = vld [vmem:[#allocation5 + $0x30] sm:$0xff]  }
  0x34   :  { %485 = vmatprep.subr.bf16.mxu0 %v694_v0  ;;  %501 = vmatprep.mubr.msk.bf16.mxu0 %vm695_vm0, %v694_v0  ;;  %v556_v3 = vld [vmem:[#allocation5 + $0x28] sm:$0xff]   ;;  %v562_v4 = vld [vmem:[#allocation7 + $0x38] sm:$0xff]   ;;  %v557_v5 = vld [vmem:[#allocation5 + $0x20] sm:$0xff]  }
  0x35   :  { %505 = vmatprep.subr.bf16.mxu1 %v694_v0  ;;  %521 = vmatprep.mubr.msk.bf16.mxu1 %vm695_vm0, %v694_v0  ;;  %v563_v6 = vld [vmem:[#allocation7 + $0x30] sm:$0xff]   ;;  %v558_v7 = vld [vmem:[#allocation5 + $0x18] sm:$0xff]   ;;  %v564_v8 = vld [vmem:[#allocation7 + $0x28] sm:$0xff]  }
  0x36   :  { %486 = vmatpush3.bf16.msra.mxu0 %v554_v1  ;;  %506 = vmatpush3.bf16.msra.mxu1 %v562_v4  ;;  %v559_v9 = vld [vmem:[#allocation5 + $0x10] sm:$0xff]   ;;  %v565_v10 = vld [vmem:[#allocation7 + $0x20] sm:$0xff]   ;;  %v560_v11 = vld [vmem:[#allocation5 + $0x8] sm:$0xff]  }
  0x37   :  { %487 = vmatprep.subr.bf16.mxu0 %v694_v0  ;;  %507 = vmatprep.subr.bf16.mxu1 %v694_v0  ;;  %v566_v12 = vld [vmem:[#allocation7 + $0x18] sm:$0xff]   ;;  %v561_v13 = vld [vmem:[#allocation5] sm:$0xff]   ;;  %v567_v14 = vld [vmem:[#allocation7 + $0x10] sm:$0xff]  }
  0x38   :  { %v78_v15 = vld [vmem:[#allocation2] sm:$0xf]  ;;  %v568_v16 = vld [vmem:[#allocation7 + $0x8] sm:$0xff]   ;;  %v569_v17 = vld [vmem:[#allocation7] sm:$0xff]  }
  0x39   :  { %v432_v18 = vld [vmem:[%s794_s2] ss:$0 sm:$0xff]  ;;  %v571_v27 = vld [vmem:[#allocation8 + $0x30] sm:$0xff]   ;;  %v572_v28 = vld [vmem:[#allocation8 + $0x28] sm:$0xff]  }
  0x3a   :  { %488 = vmatpush3.bf16.msra.mxu0 %v555_v2  ;;  %508 = vmatpush3.bf16.msra.mxu1 %v563_v6  ;;  %v570_v26 = vld [vmem:[#allocation8 + $0x38] sm:$0xff]   ;;  %v573_v36 = vld [vmem:[#allocation8 + $0x20] sm:$0xff]   ;;  %v575_v38 = vld [vmem:[#allocation8 + $0x10] sm:$0xff]  }
  0x3b   :  { %489 = vmatprep.subr.bf16.mxu0 %v694_v0  ;;  %509 = vmatprep.subr.bf16.mxu1 %v694_v0  ;;  %v441_v29 = vld [vmem:[%s796_s4] ss:$0 sm:$0xff]  ;;  %v576_v39 = vld [vmem:[#allocation8 + $0x8] sm:$0xff]   ;;  %v577_v40 = vld [vmem:[#allocation8] sm:$0xff]   ;;  %s696_s4 = smov [#allocation10]  }
  0x3c   :  { %v574_v37 = vld [vmem:[#allocation8 + $0x18] sm:$0xff]   ;;  %s421_s18 = sshll.u32 %s696_s4, 4  ;;  %s422_s18 = int_to_ptr.vmem [resolvable:$true] %s421_s18 }
  0x3d   :  { %s660_s19 = scalar_lea.vmem %s422_s18, 128  ;;  %p665_p7 = scmp.lt.s32.totalorder %s422_s18, %s422_s18 }
  0x3e   :  { %490 = vmatpush3.bf16.msra.mxu0 %v556_v3  ;;  %510 = vmatpush3.bf16.msra.mxu1 %v564_v8  ;;  %p661_p6 = scmp.ne.s32.totalorder %s422_s18, %s660_s19  ;;  %p666_p8 = scmp.lt.s32.totalorder %s660_s19, %s660_s19 }
  0x3f   :  { %491 = vmatprep.subr.bf16.mxu0 %v694_v0  ;;  %511 = vmatprep.subr.bf16.mxu1 %v694_v0 }
  0x40   :  { %p667_p9 = por %p666_p8, %p665_p7 }
  0x42   :  { %492 = vmatpush3.bf16.msra.mxu0 %v557_v5  ;;  %512 = vmatpush3.bf16.msra.mxu1 %v565_v10  ;;  %p668_p10 = pnand %p667_p9, %p661_p6 }
  0x43   :  { %493 = vmatprep.subr.bf16.mxu0 %v694_v0  ;;  %513 = vmatprep.subr.bf16.mxu1 %v694_v0 }
  0x46   :  { %494 = vmatpush3.bf16.msra.mxu0 %v558_v7  ;;  %514 = vmatpush3.bf16.msra.mxu1 %v566_v12 }
  0x47   :  { %495 = vmatprep.subr.bf16.mxu0 %v694_v0  ;;  %515 = vmatprep.subr.bf16.mxu1 %v694_v0 }
  0x4a   :  { %496 = vmatpush3.bf16.msra.mxu0 %v559_v9  ;;  %516 = vmatpush3.bf16.msra.mxu1 %v567_v14 }
  0x4b   :  { %497 = vmatprep.subr.bf16.mxu0 %v694_v0  ;;  %517 = vmatprep.subr.bf16.mxu1 %v694_v0 }
  0x4e   :  { %498 = vmatpush3.bf16.msra.mxu0 %v560_v11  ;;  %518 = vmatpush3.bf16.msra.mxu1 %v568_v16 }
  0x4f   :  { %499 = vmatprep.subr.bf16.mxu0 %v694_v0  ;;  %519 = vmatprep.subr.bf16.mxu1 %v694_v0 }
  0x52   :  { %500 = vmatpush3.bf16.msra.mxu0 %v561_v13  ;;  %520 = vmatpush3.bf16.msra.mxu1 %v569_v17 }
  0x53   :  { %525 = vmatprep.subr.bf16.mxu0 %v694_v0 }
  0x55   :  { %502 = vmatmul.mubr.bf16.vlgmr.msra.gmra.mxu0 %v78_v15 }
  0x56   :  { %541 = vmatprep.mubr.msk.bf16.mxu0 %vm695_vm0, %v694_v0  ;;  %526 = vmatpush3.bf16.msra.mxu0 %v570_v26 }
  0x57   :  { %527 = vmatprep.subr.bf16.mxu0 %v694_v0 }
  0x5a   :  { %528 = vmatpush3.bf16.msra.mxu0 %v571_v27 }
  0x5b   :  { %529 = vmatprep.subr.bf16.mxu0 %v694_v0 }
  0x5e   :  { %530 = vmatpush3.bf16.msra.mxu0 %v572_v28 }
  0x5f   :  { %531 = vmatprep.subr.bf16.mxu0 %v694_v0 }
  0x62   :  { %532 = vmatpush3.bf16.msra.mxu0 %v573_v36 }
  0x63   :  { %533 = vmatprep.subr.bf16.mxu0 %v694_v0 }
  0x66   :  { %534 = vmatpush3.bf16.msra.mxu0 %v574_v37 }
  0x67   :  { %535 = vmatprep.subr.bf16.mxu0 %v694_v0 }
  0x6a   :  { %536 = vmatpush3.bf16.msra.mxu0 %v575_v38 }
  0x6b   :  { %537 = vmatprep.subr.bf16.mxu0 %v694_v0 }
  0x6e   :  { %538 = vmatpush3.bf16.msra.mxu0 %v576_v39 }
  0x6f   :  { %539 = vmatprep.subr.bf16.mxu0 %v694_v0 }
  0x72   :  { %540 = vmatpush3.bf16.msra.mxu0 %v577_v40 }
 0x115   :  { %v184_v19 = vpop.f32.mrf.mxu0 }
 0x116   :  { %v185_v20 = vadd.f32 %v432_v18, %v184_v19 }
 0x117   :  { %v503_v21 = vpop.f32.mrf.mxu0 }
 0x118   :  { %v190_v22 = vmax.f32 %v185_v20, 0.0 }
 0x119   :  { %v187_v23 = vpop.f32.mrf.mxu0 }
 0x11a   :  { %v191_v24 = vpack.c.bf16 %v190_v22, %v190_v22 }
 0x11b   :  { %v504_v25 = vpop.f32.mrf.mxu0 }
 0x11c   :  { %522 = vmatmul.mubr.bf16.vlgmr.msra.gmra.mxu1 %v191_v24 }
 0x1dc   :  { %v297_v30 = vpop.f32.mrf.mxu1 }
 0x1dd   :  { %v298_v31 = vadd.f32 %v441_v29, %v297_v30 }
 0x1de   :  { %v523_v32 = vpop.f32.mrf.mxu1 }
 0x1df   :  { %v303_v33 = vmul.f32 %v298_v31, %v298_v31 }
 0x1e0   :  { %v300_v34 = vpop.f32.mrf.mxu1 }
 0x1e1   :  { %304 = vadd.xlane.f32.xlu0 %v303_v33 }
 0x1e2   :  { %v524_v35 = vpop.f32.mrf.mxu1 }
 0x26a   :  { %v305_v41 = vpop.xlane.xlu0 %304 }
 0x26b   :  { %v306_v42 = vmax.f32 %v305_v41, 1e-24 }
 0x26d   :  { %578 = vrsqrt.f32 %v306_v42 }
 0x27a   :  { %v579_v43 = vpop.eup %578 }
 0x27b   :  { %v308_v44 = vmul.f32 %v579_v43, %v298_v31 }
 0x27d   :  { %v309_v45 = vpack.c.bf16 %v308_v44, %v308_v44 }
 0x27f   :  { %542 = vmatmul.mubr.bf16.vlgmr.msra.gmra.mxu0 %v309_v45 }
 0x33f   :  { %v408_v46 = vpop.f32.mrf.mxu0 }
 0x340   :  { %414 = vst [vmem:[#allocation10] sm:$0xff] %v408_v46 }
 0x341   :  { %v543_v47 = vpop.f32.mrf.mxu0 }
 0x342   :  { %671 = shalt.err (!%p668_p10)
}
 0x343   :  { %424 = dma.vmem_to_hbm [thread:$0]  %s422_s18, 128, %s798_s6, [#allocation4]   ;;  %v411_v48 = vpop.f32.mrf.mxu0 }
 0x345   :  { %v544_v49 = vpop.f32.mrf.mxu0 }
 0x346   :  { %686 = dma.done.wait [#allocation4], 128  }
 0x347   :  { %687 = vsyncadd [#allocation4], 4294967168 }
 0x348   :  { %428 = vsyncpa [#allocation3], 1 }
 0x349   :  { %429 = vsyncpa [#allocation6], 1 }
 0x34a   :  { %430 = vsyncpa [#allocation9], 1 }
 0x34b   :  { %431 = vsyncpa [#allocation4], 1 }

</bundles_post_ra>
